<compile_context>
chip_gen: v7x
topology: tpu7x:2x2x1
jax: 0.10.0
libtpu: 0.0.40
codegen_flags: <defaults>
</compile_context>

<pallas_src>
import functools

import jax
import jax.numpy as jnp
from jax.experimental import pallas as pl
from jax.experimental.pallas import tpu as pltpu

LEAKY_SLOPE = 0.2
NEG_INF = -1e9


def _gat_block_kernel(x_ref, adj_ref, w_ref, asrc_ref, adst_ref, b_ref,
                      out_ref, attn_ref, *, num_heads, d_out, residual):
    """One grid step = one block of `bb` documents, all heads fused."""
    x = x_ref[...]            # (bb, N, D_in)
    adj = adj_ref[...]        # (bb, N, N)
    w_all = w_ref[...]        # (D_in, H*D_out)   heads packed along lanes
    asrc = asrc_ref[...]      # (H, D_out)
    adst = adst_ref[...]      # (H, D_out)
    bias = b_ref[...]         # (1, D_out)

    # Fused projection for all heads & all docs in the block (MXU).
    h_all = jnp.einsum("bnd,de->bne", x, w_all,
                       preferred_element_type=jnp.float32)          # (bb, N, H*D_out)
    th_all = jnp.tanh(h_all)                                        # EUP, once for all heads

    adj_pos = adj > 0
    head_outs = []
    for hh in range(num_heads):                 # static unroll over heads
        lo = hh * d_out
        h_h = h_all[:, :, lo:lo + d_out]        # (bb, N, D_out)
        th = th_all[:, :, lo:lo + d_out]        # (bb, N, D_out)
        a_s = asrc[hh:hh + 1, :]                # (1, D_out)
        a_d = adst[hh:hh + 1, :]                # (1, D_out)

        # src / dst scores: O(N*D) reductions, no (N,N,D) intermediate.
        s_src = jnp.sum(th * a_s, axis=-1, keepdims=True)           # (bb, N, 1)
        s_dst = jnp.sum(th * a_d, axis=-1)[:, None, :]              # (bb, 1, N)

        # e[i, j] = leaky_relu(src[i] + dst[j])
        scores = s_src + s_dst                                       # (bb, N, N)
        scores = jnp.where(scores > 0, scores, LEAKY_SLOPE * scores)

        # Adjacency mask + numerically stable softmax over neighbours.
        scores = jnp.where(adj_pos, scores, NEG_INF)
        m = jnp.max(scores, axis=-1, keepdims=True)
        e = jnp.exp(scores - m)
        denom = jnp.sum(e, axis=-1, keepdims=True)
        attn = e * pl.reciprocal(denom, approx=True)                 # EUP divide
        attn_ref[:, hh:hh + 1, :, :] = attn[:, None, :, :]

        # Neighbour aggregation (MXU) + bias (+ residual) + ELU.
        out_h = jnp.einsum("bij,bjd->bid", attn, h_h,
                           preferred_element_type=jnp.float32) + bias
        if residual:
            out_h = out_h + x
        out_h = jnp.where(out_h > 0, out_h, jnp.exp(out_h) - 1.0)    # ELU
        head_outs.append(out_h)

    # Concatenated-head output written once, lane-dense (bb, N, H*D_out).
    if num_heads > 1:
        out_ref[...] = jnp.concatenate(head_outs, axis=-1)
    else:
        out_ref[...] = head_outs[0]


def _pick_block_batch(B, N, D_in, H, D_out, vmem_budget_bytes=2 << 20):
    """Largest divisor of B fitting ~2 MiB/step while keeping >=2 grid steps."""
    per_doc = 4 * (
        2 * (N * D_in + N * N + N * H * D_out + H * N * N)   # double-buffered I/O
        + 3 * N * H * D_out + (2 + H) * N * N)               # h, th, out, scores/attn
    cap = max(1, vmem_budget_bytes // max(per_doc, 1))
    best = 1
    for d in range(1, B + 1):
        if B % d or d > cap:
            continue
        if d >= best and (B // d >= 2 or B == 1):
            best = d
    return best


def gat_layer(x, adj, w, a_src, a_dst, bias, block_batch=None):
    """Multi-head GAT layer. Returns (concat-head features, attention weights)."""
    B, N, D_in = x.shape
    H, _, D_out = w.shape
    residual = (D_in == D_out)

    bb = block_batch if block_batch is not None else _pick_block_batch(B, N, D_in, H, D_out)
    assert B % bb == 0

    # Host-side one-time packing: w (H, D_in, D_out) -> (D_in, H*D_out) so the
    # kernel does a single fused projection; a_src/a_dst -> (H, D_out).
    w_all = jnp.transpose(w, (1, 0, 2)).reshape(D_in, H * D_out)
    asrc = a_src.reshape(H, D_out)
    adst = a_dst.reshape(H, D_out)

    kernel = functools.partial(_gat_block_kernel, num_heads=H, d_out=D_out,
                               residual=residual)
    out, attn = pl.pallas_call(
        kernel,
        out_shape=(
            jax.ShapeDtypeStruct((B, N, H * D_out), jnp.float32),
            jax.ShapeDtypeStruct((B, H, N, N), jnp.float32),
        ),
        grid_spec=pltpu.PrefetchScalarGridSpec(
            num_scalar_prefetch=0,
            grid=(B // bb,),
            in_specs=[
                pl.BlockSpec((bb, N, D_in), lambda b: (b, 0, 0)),       # x
                pl.BlockSpec((bb, N, N), lambda b: (b, 0, 0)),          # adj
                pl.BlockSpec((D_in, H * D_out), lambda b: (0, 0)),      # w_all (resident)
                pl.BlockSpec((H, D_out), lambda b: (0, 0)),             # a_src (resident)
                pl.BlockSpec((H, D_out), lambda b: (0, 0)),             # a_dst (resident)
                pl.BlockSpec((1, D_out), lambda b: (0, 0)),             # bias  (resident)
            ],
            out_specs=[
                pl.BlockSpec((bb, N, H * D_out), lambda b: (b, 0, 0)),  # concat heads
                pl.BlockSpec((bb, H, N, N), lambda b: (b, 0, 0, 0)),    # attention W
            ],
        ),
        compiler_params=pltpu.CompilerParams(
            dimension_semantics=("parallel",)),
    )(x, adj, w_all, asrc, adst, bias)
    return out, attn


def init_params(key, emb_dim, gat_feat_dim, multihead):
    """Deterministic synthetic parameters (xavier-ish normal init)."""
    k1, k2, k3 = jax.random.split(key, 3)
    scale_w = 1.0 / jnp.sqrt(jnp.float32(emb_dim))
    scale_a = 1.0 / jnp.sqrt(jnp.float32(gat_feat_dim))
    w = scale_w * jax.random.normal(k1, (multihead, emb_dim, gat_feat_dim), jnp.float32)
    a_src = scale_a * jax.random.normal(k2, (multihead, 1, gat_feat_dim), jnp.float32)
    a_dst = scale_a * jax.random.normal(k3, (multihead, 1, gat_feat_dim), jnp.float32)
    bias = jnp.zeros((1, gat_feat_dim), jnp.float32)
    return dict(w=w, a_src=a_src, a_dst=a_dst, bias=bias)


def gatvae_encoder_forward(params, doc_sents_h, doc_len, adj):
    """Mirrors GATVAEencoder.forward: single GAT layer, returns (doc_sents_h, W)."""
    batch, max_doc_len, _ = doc_sents_h.shape
    assert int(max(doc_len)) == max_doc_len
    doc_sents_h, W = gat_layer(
        doc_sents_h, adj,
        params["w"], params["a_src"], params["a_dst"], params["bias"])
    return doc_sents_h, W


def _reference_forward(params, x, adj):
    """Pure-JAX reference of the same math (exact division) for validation."""
    B, N, _ = x.shape
    H, _, D = params["w"].shape
    outs, attns = [], []
    for hh in range(H):
        h = jnp.einsum("bnd,de->bne", x, params["w"][hh])
        th = jnp.tanh(h)
        s_src = jnp.sum(th * params["a_src"][hh][None], axis=-1)        # (B, N)
        s_dst = jnp.sum(th * params["a_dst"][hh][None], axis=-1)        # (B, N)
        scores = s_src[:, :, None] + s_dst[:, None, :]
        scores = jnp.where(scores > 0, scores, LEAKY_SLOPE * scores)
        scores = jnp.where(adj > 0, scores, NEG_INF)
        attn = jax.nn.softmax(scores, axis=-1)
        o = jnp.einsum("bij,bjd->bid", attn, h) + params["bias"][None]
        if params["w"].shape[1] == D:
            o = o + x
        o = jnp.where(o > 0, o, jnp.exp(o) - 1.0)
        outs.append(o)
        attns.append(attn)
    return jnp.concatenate(outs, axis=-1), jnp.stack(attns, axis=1)


if __name__ == "__main__":
    # Small config consistent with the module: emb_dim=32, gat_feat_dim=16, multihead=2.
    B, N, EMB, FEAT, HEADS = 2, 8, 32, 16, 2

    key = jax.random.PRNGKey(0)
    kx, kp = jax.random.split(key)

    doc_sents_h = jax.random.normal(kx, (B, N, EMB), jnp.float32)
    doc_len = [8, 6]
    # Adjacency: fully connected among valid sentences of each doc.
    valid = (jnp.arange(N)[None, :] < jnp.asarray(doc_len)[:, None]).astype(jnp.float32)
    adj = valid[:, :, None] * valid[:, None, :]                      # (B, N, N)

    params = init_params(kp, EMB, FEAT, HEADS)

    out_h, W = gatvae_encoder_forward(params, doc_sents_h, doc_len, adj)
    out_h = jax.block_until_ready(out_h)
    W = jax.block_until_ready(W)

    assert out_h.shape == (B, N, HEADS * FEAT)
    assert W.shape == (B, HEADS, N, N)
    assert bool(jnp.all(jnp.isfinite(out_h))) and bool(jnp.all(jnp.isfinite(W)))

    # Attention rows must sum to ~1 (approx reciprocal -> loose tolerance).
    row_sums = jnp.sum(W[0, 0], axis=-1)
    assert bool(jnp.allclose(row_sums, 1.0, atol=1e-2))

    # Validate against a pure-JAX reference of the same math.
    ref_h, ref_W = _reference_forward(params, doc_sents_h, adj)
    assert bool(jnp.allclose(out_h, ref_h, atol=2e-2, rtol=2e-2))
    assert bool(jnp.allclose(W, ref_W, atol=2e-2, rtol=2e-2))

    print("KERNEL_OK")
</pallas_src>

<mosaic_0001>
module attributes {stable_mosaic.version = 11 : i64} {
  func.func @_gat_block_kernel(%arg0: i32, %arg1: memref<1x8x32xf32, #tpu.memory_space<vmem>>, %arg2: memref<1x8x8xf32, #tpu.memory_space<vmem>>, %arg3: memref<32x32xf32, #tpu.memory_space<vmem>>, %arg4: memref<2x16xf32, #tpu.memory_space<vmem>>, %arg5: memref<2x16xf32, #tpu.memory_space<vmem>>, %arg6: memref<1x16xf32, #tpu.memory_space<vmem>>, %arg7: memref<1x8x32xf32, #tpu.memory_space<vmem>>, %arg8: memref<1x2x8x8xf32, #tpu.memory_space<vmem>>) attributes {dimension_semantics = [#tpu.dimension_semantics<parallel>], iteration_bounds = array<i64: 2>, scalar_prefetch = 0 : i64, scratch_operands = 0 : i64, tpu.core_type = #tpu.core_type<tc>, window_params = [{transform_indices = @transform_0, window_bounds = array<i64: 1, 8, 32>}, {transform_indices = @transform_1, window_bounds = array<i64: 1, 8, 8>}, {pipeline_mode = #tpu.pipeline_mode<synchronous>, transform_indices = @transform_2, window_bounds = array<i64: 32, 32>}, {pipeline_mode = #tpu.pipeline_mode<synchronous>, transform_indices = @transform_3, window_bounds = array<i64: 2, 16>}, {pipeline_mode = #tpu.pipeline_mode<synchronous>, transform_indices = @transform_4, window_bounds = array<i64: 2, 16>}, {pipeline_mode = #tpu.pipeline_mode<synchronous>, transform_indices = @transform_5, window_bounds = array<i64: 1, 16>}, {transform_indices = @transform_6, window_bounds = array<i64: 1, 8, 32>}, {transform_indices = @transform_7, window_bounds = array<i64: 1, 2, 8, 8>}]} {
    %c0 = arith.constant 0 : index
    %c0_0 = arith.constant 0 : index
    %c0_1 = arith.constant 0 : index
    %0 = vector.load %arg1[%c0, %c0_0, %c0_1] : memref<1x8x32xf32, #tpu.memory_space<vmem>>, vector<1x8x32xf32>
    %c0_2 = arith.constant 0 : index
    %c0_3 = arith.constant 0 : index
    %c0_4 = arith.constant 0 : index
    %1 = vector.load %arg2[%c0_2, %c0_3, %c0_4] : memref<1x8x8xf32, #tpu.memory_space<vmem>>, vector<1x8x8xf32>
    %c0_5 = arith.constant 0 : index
    %c0_6 = arith.constant 0 : index
    %2 = vector.load %arg3[%c0_5, %c0_6] : memref<32x32xf32, #tpu.memory_space<vmem>>, vector<32x32xf32>
    %c0_7 = arith.constant 0 : index
    %c0_8 = arith.constant 0 : index
    %3 = vector.load %arg4[%c0_7, %c0_8] : memref<2x16xf32, #tpu.memory_space<vmem>>, vector<2x16xf32>
    %c0_9 = arith.constant 0 : index
    %c0_10 = arith.constant 0 : index
    %4 = vector.load %arg5[%c0_9, %c0_10] : memref<2x16xf32, #tpu.memory_space<vmem>>, vector<2x16xf32>
    %c0_11 = arith.constant 0 : index
    %c0_12 = arith.constant 0 : index
    %5 = vector.load %arg6[%c0_11, %c0_12] : memref<1x16xf32, #tpu.memory_space<vmem>>, vector<1x16xf32>
    "tpu.trace_start"() <{level = 10 : i32, message = "bnd,de->bne"}> : () -> ()
    %cst = arith.constant dense<0.000000e+00> : vector<1x8x32xf32>
    %6 = tpu.matmul %0, %2, %cst {dimension_numbers = #tpu.dot_dimension_numbers<[2], [0], [0, 1], [1], [0, 0, 0, 1, 1, 1], [], []>} : vector<1x8x32xf32>, vector<32x32xf32>, vector<1x8x32xf32> -> vector<1x8x32xf32>
    "tpu.trace_stop"() : () -> ()
    %7 = math.tanh %6 : vector<1x8x32xf32>
    %cst_13 = arith.constant 0.000000e+00 : f32
    %8 = vector.broadcast %cst_13 : f32 to vector<1x8x8xf32>
    %9 = arith.cmpf ogt, %1, %8 : vector<1x8x8xf32>
    %10 = vector.extract_strided_slice %6 {offsets = [0, 0, 0], sizes = [1, 8, 16], strides = [1, 1, 1]} : vector<1x8x32xf32> to vector<1x8x16xf32>
    %11 = vector.extract_strided_slice %7 {offsets = [0, 0, 0], sizes = [1, 8, 16], strides = [1, 1, 1]} : vector<1x8x32xf32> to vector<1x8x16xf32>
    %12 = vector.extract_strided_slice %3 {offsets = [0, 0], sizes = [1, 16], strides = [1, 1]} : vector<2x16xf32> to vector<1x16xf32>
    %13 = vector.extract_strided_slice %4 {offsets = [0, 0], sizes = [1, 16], strides = [1, 1]} : vector<2x16xf32> to vector<1x16xf32>
    %14 = vector.shape_cast %12 : vector<1x16xf32> to vector<1x1x16xf32>
    %15 = vector.broadcast %14 : vector<1x1x16xf32> to vector<1x8x16xf32>
    %16 = arith.mulf %11, %15 : vector<1x8x16xf32>
    %cst_14 = arith.constant dense<0.000000e+00> : vector<1x8xf32>
    %17 = vector.multi_reduction <add>, %16, %cst_14 [2] : vector<1x8x16xf32> to vector<1x8xf32>
    %18 = vector.shape_cast %17 : vector<1x8xf32> to vector<1x8x1xf32>
    %19 = vector.shape_cast %13 : vector<1x16xf32> to vector<1x1x16xf32>
    %20 = vector.broadcast %19 : vector<1x1x16xf32> to vector<1x8x16xf32>
    %21 = arith.mulf %11, %20 : vector<1x8x16xf32>
    %cst_15 = arith.constant dense<0.000000e+00> : vector<1x8xf32>
    %22 = vector.multi_reduction <add>, %21, %cst_15 [2] : vector<1x8x16xf32> to vector<1x8xf32>
    %23 = vector.shape_cast %22 : vector<1x8xf32> to vector<1x1x8xf32>
    %24 = vector.broadcast %18 : vector<1x8x1xf32> to vector<1x8x8xf32>
    %25 = vector.broadcast %23 : vector<1x1x8xf32> to vector<1x8x8xf32>
    %26 = arith.addf %24, %25 : vector<1x8x8xf32>
    %cst_16 = arith.constant 0.000000e+00 : f32
    %27 = vector.broadcast %cst_16 : f32 to vector<1x8x8xf32>
    %28 = arith.cmpf ogt, %26, %27 : vector<1x8x8xf32>
    %cst_17 = arith.constant 2.000000e-01 : f32
    %29 = vector.broadcast %cst_17 : f32 to vector<1x8x8xf32>
    %30 = arith.mulf %29, %26 : vector<1x8x8xf32>
    %31 = arith.select %28, %26, %30 : vector<1x8x8xi1>, vector<1x8x8xf32>
    %cst_18 = arith.constant -1.000000e+09 : f32
    %32 = vector.broadcast %cst_18 : f32 to vector<1x8x8xf32>
    %33 = arith.select %9, %31, %32 : vector<1x8x8xi1>, vector<1x8x8xf32>
    %cst_19 = arith.constant dense<0xFF800000> : vector<1x8xf32>
    %34 = vector.multi_reduction <maximumf>, %33, %cst_19 [2] : vector<1x8x8xf32> to vector<1x8xf32>
    %35 = vector.shape_cast %34 : vector<1x8xf32> to vector<1x8x1xf32>
    %36 = vector.broadcast %35 : vector<1x8x1xf32> to vector<1x8x8xf32>
    %37 = arith.subf %33, %36 : vector<1x8x8xf32>
    %38 = math.exp %37 : vector<1x8x8xf32>
    %cst_20 = arith.constant dense<0.000000e+00> : vector<1x8xf32>
    %39 = vector.multi_reduction <add>, %38, %cst_20 [2] : vector<1x8x8xf32> to vector<1x8xf32>
    %40 = vector.shape_cast %39 : vector<1x8xf32> to vector<1x8x1xf32>
    %41 = tpu.reciprocal %40 {approx = true} : vector<1x8x1xf32> -> vector<1x8x1xf32>
    %42 = vector.broadcast %41 : vector<1x8x1xf32> to vector<1x8x8xf32>
    %43 = arith.mulf %38, %42 : vector<1x8x8xf32>
    %44 = vector.shape_cast %43 : vector<1x8x8xf32> to vector<1x1x8x8xf32>
    %c0_21 = arith.constant 0 : index
    %c0_22 = arith.constant 0 : index
    %c0_23 = arith.constant 0 : index
    %c0_24 = arith.constant 0 : index
    %45 = vector.load %arg8[%c0_21, %c0_22, %c0_23, %c0_24] : memref<1x2x8x8xf32, #tpu.memory_space<vmem>>, vector<1x1x8x8xf32>
    tpu.vector_store %arg8[%c0_21, %c0_22, %c0_23, %c0_24], %44 {strides = array<i32>} : memref<1x2x8x8xf32, #tpu.memory_space<vmem>>, vector<1x1x8x8xf32>,
    "tpu.trace_start"() <{level = 10 : i32, message = "bij,bjd->bid"}> : () -> ()
    %cst_25 = arith.constant dense<0.000000e+00> : vector<1x8x16xf32>
    %46 = tpu.matmul %43, %10, %cst_25 {dimension_numbers = #tpu.dot_dimension_numbers<[2], [1], [1], [2], [0, 0, 0, 1, 1, 2], [0], [0]>} : vector<1x8x8xf32>, vector<1x8x16xf32>, vector<1x8x16xf32> -> vector<1x8x16xf32>
    "tpu.trace_stop"() : () -> ()
    %47 = vector.shape_cast %5 : vector<1x16xf32> to vector<1x1x16xf32>
    %48 = vector.broadcast %47 : vector<1x1x16xf32> to vector<1x8x16xf32>
    %49 = arith.addf %46, %48 : vector<1x8x16xf32>
    %cst_26 = arith.constant 0.000000e+00 : f32
    %50 = vector.broadcast %cst_26 : f32 to vector<1x8x16xf32>
    %51 = arith.cmpf ogt, %49, %50 : vector<1x8x16xf32>
    %52 = math.exp %49 : vector<1x8x16xf32>
    %cst_27 = arith.constant 1.000000e+00 : f32
    %53 = vector.broadcast %cst_27 : f32 to vector<1x8x16xf32>
    %54 = arith.subf %52, %53 : vector<1x8x16xf32>
    %55 = arith.select %51, %49, %54 : vector<1x8x16xi1>, vector<1x8x16xf32>
    %56 = vector.extract_strided_slice %6 {offsets = [0, 0, 16], sizes = [1, 8, 16], strides = [1, 1, 1]} : vector<1x8x32xf32> to vector<1x8x16xf32>
    %57 = vector.extract_strided_slice %7 {offsets = [0, 0, 16], sizes = [1, 8, 16], strides = [1, 1, 1]} : vector<1x8x32xf32> to vector<1x8x16xf32>
    %58 = vector.extract_strided_slice %3 {offsets = [1, 0], sizes = [1, 16], strides = [1, 1]} : vector<2x16xf32> to vector<1x16xf32>
    %59 = vector.extract_strided_slice %4 {offsets = [1, 0], sizes = [1, 16], strides = [1, 1]} : vector<2x16xf32> to vector<1x16xf32>
    %60 = vector.shape_cast %58 : vector<1x16xf32> to vector<1x1x16xf32>
    %61 = vector.broadcast %60 : vector<1x1x16xf32> to vector<1x8x16xf32>
    %62 = arith.mulf %57, %61 : vector<1x8x16xf32>
    %cst_28 = arith.constant dense<0.000000e+00> : vector<1x8xf32>
    %63 = vector.multi_reduction <add>, %62, %cst_28 [2] : vector<1x8x16xf32> to vector<1x8xf32>
    %64 = vector.shape_cast %63 : vector<1x8xf32> to vector<1x8x1xf32>
    %65 = vector.shape_cast %59 : vector<1x16xf32> to vector<1x1x16xf32>
    %66 = vector.broadcast %65 : vector<1x1x16xf32> to vector<1x8x16xf32>
    %67 = arith.mulf %57, %66 : vector<1x8x16xf32>
    %cst_29 = arith.constant dense<0.000000e+00> : vector<1x8xf32>
    %68 = vector.multi_reduction <add>, %67, %cst_29 [2] : vector<1x8x16xf32> to vector<1x8xf32>
    %69 = vector.shape_cast %68 : vector<1x8xf32> to vector<1x1x8xf32>
    %70 = vector.broadcast %64 : vector<1x8x1xf32> to vector<1x8x8xf32>
    %71 = vector.broadcast %69 : vector<1x1x8xf32> to vector<1x8x8xf32>
    %72 = arith.addf %70, %71 : vector<1x8x8xf32>
    %cst_30 = arith.constant 0.000000e+00 : f32
    %73 = vector.broadcast %cst_30 : f32 to vector<1x8x8xf32>
    %74 = arith.cmpf ogt, %72, %73 : vector<1x8x8xf32>
    %cst_31 = arith.constant 2.000000e-01 : f32
    %75 = vector.broadcast %cst_31 : f32 to vector<1x8x8xf32>
    %76 = arith.mulf %75, %72 : vector<1x8x8xf32>
    %77 = arith.select %74, %72, %76 : vector<1x8x8xi1>, vector<1x8x8xf32>
    %cst_32 = arith.constant -1.000000e+09 : f32
    %78 = vector.broadcast %cst_32 : f32 to vector<1x8x8xf32>
    %79 = arith.select %9, %77, %78 : vector<1x8x8xi1>, vector<1x8x8xf32>
    %cst_33 = arith.constant dense<0xFF800000> : vector<1x8xf32>
    %80 = vector.multi_reduction <maximumf>, %79, %cst_33 [2] : vector<1x8x8xf32> to vector<1x8xf32>
    %81 = vector.shape_cast %80 : vector<1x8xf32> to vector<1x8x1xf32>
    %82 = vector.broadcast %81 : vector<1x8x1xf32> to vector<1x8x8xf32>
    %83 = arith.subf %79, %82 : vector<1x8x8xf32>
    %84 = math.exp %83 : vector<1x8x8xf32>
    %cst_34 = arith.constant dense<0.000000e+00> : vector<1x8xf32>
    %85 = vector.multi_reduction <add>, %84, %cst_34 [2] : vector<1x8x8xf32> to vector<1x8xf32>
    %86 = vector.shape_cast %85 : vector<1x8xf32> to vector<1x8x1xf32>
    %87 = tpu.reciprocal %86 {approx = true} : vector<1x8x1xf32> -> vector<1x8x1xf32>
    %88 = vector.broadcast %87 : vector<1x8x1xf32> to vector<1x8x8xf32>
    %89 = arith.mulf %84, %88 : vector<1x8x8xf32>
    %90 = vector.shape_cast %89 : vector<1x8x8xf32> to vector<1x1x8x8xf32>
    %c0_35 = arith.constant 0 : index
    %c1 = arith.constant 1 : index
    %c0_36 = arith.constant 0 : index
    %c0_37 = arith.constant 0 : index
    %91 = vector.load %arg8[%c0_35, %c1, %c0_36, %c0_37] : memref<1x2x8x8xf32, #tpu.memory_space<vmem>>, vector<1x1x8x8xf32>
    tpu.vector_store %arg8[%c0_35, %c1, %c0_36, %c0_37], %90 {strides = array<i32>} : memref<1x2x8x8xf32, #tpu.memory_space<vmem>>, vector<1x1x8x8xf32>,
    "tpu.trace_start"() <{level = 10 : i32, message = "bij,bjd->bid"}> : () -> ()
    %cst_38 = arith.constant dense<0.000000e+00> : vector<1x8x16xf32>
    %92 = tpu.matmul %89, %56, %cst_38 {dimension_numbers = #tpu.dot_dimension_numbers<[2], [1], [1], [2], [0, 0, 0, 1, 1, 2], [0], [0]>} : vector<1x8x8xf32>, vector<1x8x16xf32>, vector<1x8x16xf32> -> vector<1x8x16xf32>
    "tpu.trace_stop"() : () -> ()
    %93 = vector.shape_cast %5 : vector<1x16xf32> to vector<1x1x16xf32>
    %94 = vector.broadcast %93 : vector<1x1x16xf32> to vector<1x8x16xf32>
    %95 = arith.addf %92, %94 : vector<1x8x16xf32>
    %cst_39 = arith.constant 0.000000e+00 : f32
    %96 = vector.broadcast %cst_39 : f32 to vector<1x8x16xf32>
    %97 = arith.cmpf ogt, %95, %96 : vector<1x8x16xf32>
    %98 = math.exp %95 : vector<1x8x16xf32>
    %cst_40 = arith.constant 1.000000e+00 : f32
    %99 = vector.broadcast %cst_40 : f32 to vector<1x8x16xf32>
    %100 = arith.subf %98, %99 : vector<1x8x16xf32>
    %101 = arith.select %97, %95, %100 : vector<1x8x16xi1>, vector<1x8x16xf32>
    %102 = tpu.concatenate %55, %101 in 2 : vector<1x8x16xf32>, vector<1x8x16xf32> -> vector<1x8x32xf32>
    %c0_41 = arith.constant 0 : index
    %c0_42 = arith.constant 0 : index
    %c0_43 = arith.constant 0 : index
    %103 = vector.load %arg7[%c0_41, %c0_42, %c0_43] : memref<1x8x32xf32, #tpu.memory_space<vmem>>, vector<1x8x32xf32>
    tpu.vector_store %arg7[%c0_41, %c0_42, %c0_43], %102 {strides = array<i32>} : memref<1x8x32xf32, #tpu.memory_space<vmem>>, vector<1x8x32xf32>,
    return
  }
  func.func @transform_0(%arg0: i32) -> (i32, i32, i32) {
    %c0_i32 = arith.constant 0 : i32
    %c0_i32_0 = arith.constant 0 : i32
    %c0_i32_1 = arith.constant 0 : i32
    return %arg0, %c0_i32, %c0_i32_0 : i32, i32, i32
  }
  func.func @transform_1(%arg0: i32) -> (i32, i32, i32) {
    %c0_i32 = arith.constant 0 : i32
    %c0_i32_0 = arith.constant 0 : i32
    %c0_i32_1 = arith.constant 0 : i32
    return %arg0, %c0_i32, %c0_i32_0 : i32, i32, i32
  }
  func.func @transform_2(%arg0: i32) -> (i32, i32) {
    %c0_i32 = arith.constant 0 : i32
    %c0_i32_0 = arith.constant 0 : i32
    %c0_i32_1 = arith.constant 0 : i32
    return %c0_i32, %c0_i32_0 : i32, i32
  }
  func.func @transform_3(%arg0: i32) -> (i32, i32) {
    %c0_i32 = arith.constant 0 : i32
    %c0_i32_0 = arith.constant 0 : i32
    %c0_i32_1 = arith.constant 0 : i32
    return %c0_i32, %c0_i32_0 : i32, i32
  }
  func.func @transform_4(%arg0: i32) -> (i32, i32) {
    %c0_i32 = arith.constant 0 : i32
    %c0_i32_0 = arith.constant 0 : i32
    %c0_i32_1 = arith.constant 0 : i32
    return %c0_i32, %c0_i32_0 : i32, i32
  }
  func.func @transform_5(%arg0: i32) -> (i32, i32) {
    %c0_i32 = arith.constant 0 : i32
    %c0_i32_0 = arith.constant 0 : i32
    %c0_i32_1 = arith.constant 0 : i32
    return %c0_i32, %c0_i32_0 : i32, i32
  }
  func.func @transform_6(%arg0: i32) -> (i32, i32, i32) {
    %c0_i32 = arith.constant 0 : i32
    %c0_i32_0 = arith.constant 0 : i32
    %c0_i32_1 = arith.constant 0 : i32
    return %arg0, %c0_i32, %c0_i32_0 : i32, i32, i32
  }
  func.func @transform_7(%arg0: i32) -> (i32, i32, i32, i32) {
    %c0_i32 = arith.constant 0 : i32
    %c0_i32_0 = arith.constant 0 : i32
    %c0_i32_1 = arith.constant 0 : i32
    %c0_i32_2 = arith.constant 0 : i32
    return %arg0, %c0_i32, %c0_i32_0, %c0_i32_1 : i32, i32, i32, i32
  }
}

</mosaic_0001>

<bundles_post_ra>
// kernel: tpu_custom_call.1
= control target key start
LH: loop header
LB: loop body
LE: loop exit
PB: predicated region body
PF: predicated region fallthrough
CT: control target
= control target key end

     0   :  { %s1614_s0 = inlined_call_operand.hbm [shape: f32[2,8,32], index: 0, kind: input, shape index: {}]   ;;  %s1615_s1 = inlined_call_operand.hbm [shape: f32[2,8,8], index: 1, kind: input, shape index: {}]   ;;  %s1616_s2 = inlined_call_operand.hbm [shape: f32[32,32], index: 2, kind: input, shape index: {}]   ;;  %s1617_s3 = inlined_call_operand.vmem [shape: f32[2,16], index: 3, kind: input, shape index: {}]   ;;  %s1618_s4 = inlined_call_operand.vmem [shape: f32[2,16], index: 4, kind: input, shape index: {}]   ;;  %s1619_s5 = inlined_call_operand.vmem [shape: f32[1,16], index: 5, kind: input, shape index: {}]   ;;  %s1620_s6 = inlined_call_operand.hbm [shape: f32[2,8,32], index: 6, kind: output, shape index: {0}]   ;;  %s1621_s7 = inlined_call_operand.hbm [shape: f32[2,2,8,8], index: 7, kind: output, shape index: {1}]  }
   0x1   :  { %1629 = sst [smem:[#allocation19_spill]] %s1616_s2 }
   0x2   :  { %13 = vsyncpa [#allocation3], 0 }
   0x3   :  { %15 = vsyncpa [#allocation3 + $0x1], 0 }
   0x4   :  { %16 = vsyncpa [#allocation6], 0 }
   0x5   :  { %18 = vsyncpa [#allocation6 + $0x1], 0 }
   0x6   :  { %19 = vsyncpa [#allocation4], 0 }
   0x7   :  { %21 = vsyncpa [#allocation4 + $0x1], 0 }
   0x8   :  { %22 = vsyncpa [#allocation10], 0 }
   0x9   :  { %24 = vsyncpa [#allocation10 + $0x1], 0  ;;  %s1304_s24 = smov 0   ;;  %s1306_s25 = smov 0  }
   0xa   :  { %s1308_s26 = smov 0   ;;  %s1310_s27 = smov 0  }
   0xb LB: > { %1630 = sst [smem:[#allocation16_spill]] %s1244_s26  ;;  %s1325_s28 = sadd.s32 4294967295, %s1248_s27   ;;  %s1248_s27 = sphi %s1310_s27, %s1648_s27   ;;  %s1244_s26 = sphi %s1308_s26, %s1650_s26   ;;  %s1240_s25 = sphi %s1306_s25, %s1652_s25   ;;  %s1236_s24 = sphi %s1304_s24, %s1651_s24  }
   0xc   : > { %s899_s29 = sadd.s32 4294967294, %s1248_s27   ;;  %p50_p0 = scmp.ne.s32.totalorder %s1240_s25, %s1236_s24 }
   0xd   : > { %p1622_p1 = scmp.eq.s32.totalorder %s1325_s28, 0  ;;  %p190_p3 = scmp.eq.s32.totalorder %s899_s29, 1 }
   0xe   : > { %p900_p5 = scmp.ge.s32.totalorder %s1248_s27, 1  ;;  %p223_p7 = scmp.lt.s32.totalorder %s1248_s27, 3 }
   0xf   : > { %p1334_p4 = por %p1622_p1, %p50_p0  ;;  %p1339_p6 = por %p190_p3, %p50_p0 }
  0x10   : > { %p1344_p8 = pnand %p900_p5, %p223_p7  ;;  %s1250_s10 = smov [#allocation7]  }
  0x11   : > { %s1631_s30 = scalar_select %p1334_p4, 1, 0 }
  0x12   : > { %s1632_s8 = scalar_select %p1339_p6, 1, 0 }
  0x13   : > { %s1633_s9 = scalar_select %p1344_p8, 1, 0 }
  0x14   : > { %s235_s11 = sshll.u32 %s1250_s10, 4  ;;  %p976_p9 = pneg %p1344_p8  ;;  %s1348_s11 = int_to_ptr.vmem [resolvable:$true] %s235_s11 }
  0x15   : > { %s1360_s13 = sadd.s32 1, %s1248_s27   ;;  %s37_s14 = sadd.s32 1, %s1244_s26 }
  0x16   : > { %p1355_p11 = pnand %p976_p9, %p1622_p1  ;;  %1635 = sst [smem:[#allocation17_spill]] %s1360_s13 }
  0x17   : > { %s34_s15 = ssub.s32 %s1248_s27, %s1360_s13  ;;  %s1636_s2 = sld [smem:[#allocation19_spill]] }
  0x18   : > { %p1056_p13 = pneg %p1355_p11 }
  0x1d   : > { %s1054_s18 = scalar_lea.hbm %s1636_s2, 512 }
  0x1e   : > { %p1055_p12 = scmp.ne.s32.totalorder %s1636_s2, %s1054_s18  ;;  %p1061_p5 = scmp.lt.u32.totalorder %s1054_s18, %s1636_s2 }
  0x20   : > { %p1057_p0 = pnand %p1056_p13, %p1055_p12 }
  0x22   : > { %p1058_p3 = pneg %p1057_p0 }
  0x24   : > { %p1063_p7 = pnand %p1061_p5, %p1058_p3 }
  0x26   : > { %1066 = shalt.err (!%p1063_p7)
}
  0x27   : > { %s1067_s23 = scalar_lea.vmem %s1348_s11, 512  ;;  %p1075_p2 = scmp.lt.s32.totalorder %s1348_s11, %s1348_s11 }
  0x28   : > { %p1068_p9 = scmp.ne.s32.totalorder %s1348_s11, %s1067_s23  ;;  %p1076_p6 = scmp.lt.s32.totalorder %s1067_s23, %s1067_s23 }
  0x2a   : > { %p1070_p10 = pnand %p1068_p9, %p1056_p13  ;;  %p1077_p4 = por %p1076_p6, %p1075_p2 }
  0x2c   : > { %p1071_p1 = pneg %p1070_p10 }
  0x2e   : > { %p1078_p8 = pnand %p1077_p4, %p1071_p1 }
  0x30   : > { %1081 = shalt.err (!%p1078_p8)
}
  0x31   : > { %s1251_s29 = smov 128   ;;  %s1252_s10 = smov 8  }
  0x32   : > { %979 = dma.hbm_to_vmem [thread:$0]  (!%p1355_p11), %s1636_s2, 512, %s1348_s11, [#allocation6], %s1251_s29, %s1251_s29, %s1252_s10  }
  0x33   : > { %p35_p2 = scmp.eq.s32.totalorder %s34_s15, 0  ;;  %p44_p1 = scmp.ne.s32.totalorder %s1244_s26, %s1240_s25 }
  0x34   : > { %p45_p4 = scmp.eq.s32.totalorder %s1248_s27, 0  ;;  %p995_p6 = scmp.lt.s32.totalorder %s1248_s27, 2 }
  0x35   : > { %s1391_s18 = scalar_select %p35_p2, %s1244_s26, %s37_s14  }
  0x36   : > { %p46_p8 = por %p45_p4, %p44_p1  ;;  %p1638_p10 = scmp.eq.s32.totalorder %s1325_s28, 1 }
  0x37   : > { %1637 = sst [smem:[#allocation18_spill]] %s1391_s18  ;;  %s258_s20 = sand.u32 1, %s1244_s26  }
  0x38   : > { %p1395_p12 = por %p1638_p10, %p44_p1  ;;  %s904_s21 = sshll.u32 %s1248_s27, 7 }
  0x39   : > { %s1401_s22 = sshll.u32 %s258_s20, 3  ;;  %s1406_s11 = scalar_lea.hbm %s1614_s0, %s904_s21 }
  0x3a   : > { %s1639_s19 = scalar_select %p1395_p12, 1, 0 }
  0x3b   : > { %s262_s14 = scalar_lea.vmem [#allocation2], %s1401_s22  ;;  %p1409_p11 = pnand %p995_p6, %p46_p8 }
  0x3c   : > { %s269_s15 = sshll.u32 %s262_s14, 4  ;;  %s1418_s17 = scalar_lea.hbm %s1615_s1, %s904_s21  ;;  %s1413_s15 = int_to_ptr.vmem [resolvable:$true] %s269_s15 }
  0x3d   : > { %s259_s12 = scalar_lea.sflag [#allocation3], %s258_s20  ;;  %s1082_s23 = scalar_lea.hbm %s1406_s11, 128 }
  0x3e   : > { %p1083_p13 = scmp.ne.s32.totalorder %s1406_s11, %s1082_s23  ;;  %p1084_p0 = pneg %p1409_p11 }
  0x3f   : > { %s1087_s18 = scalar_lea.hbm %s1614_s0, 256  ;;  %p1088_p7 = scmp.lt.u32.totalorder %s1406_s11, %s1614_s0 }
  0x40   : > { %p1085_p3 = pnand %p1084_p0, %p1083_p13  ;;  %p1089_p9 = scmp.lt.u32.totalorder %s1087_s18, %s1082_s23 }
  0x41   : > { %p1091_p1 = scmp.lt.u32.totalorder %s1082_s23, %s1406_s11 }
  0x42   : > { %p1086_p5 = pneg %p1085_p3  ;;  %p1090_p2 = por %p1089_p9, %p1088_p7 }
  0x44   : > { %p1092_p4 = por %p1091_p1, %p1090_p2 }
  0x46   : > { %p1093_p6 = pnand %p1092_p4, %p1086_p5 }
  0x48   : > { %1096 = shalt.err (!%p1093_p6)
}
  0x49   : > { %s1097_s20 = scalar_lea.vmem %s1413_s15, 128  ;;  %s1253_s2 = smov [#allocation2]  }
  0x4a   : > { %p1098_p8 = scmp.ne.s32.totalorder %s1413_s15, %s1097_s20  ;;  %s1102_s21 = sshll.u32 %s1253_s2, 4  ;;  %s1103_s21 = int_to_ptr.vmem [resolvable:$false] %s1102_s21 }
  0x4b   : > { %s1104_s26 = scalar_lea.vmem %s1103_s21, 256  ;;  %p1105_p3 = scmp.lt.s32.totalorder %s1413_s15, %s1103_s21 }
  0x4c   : > { %p1100_p10 = pnand %p1098_p8, %p1084_p0  ;;  %p1106_p7 = scmp.lt.s32.totalorder %s1104_s26, %s1097_s20 }
  0x4e   : > { %p1101_p13 = pneg %p1100_p10  ;;  %p1107_p9 = por %p1106_p7, %p1105_p3 }
  0x50   : > { %p1108_p2 = pnand %p1107_p9, %p1101_p13 }
  0x52   : > { %1111 = shalt.err (!%p1108_p2)
}
  0x53   : > { %983 = dma.hbm_to_vmem [thread:$0]  (!%p1409_p11), %s1406_s11, 128, %s1413_s15, %s259_s12  }
  0x54   : > { %s276_s13 = sand.u32 1, %s1248_s27   ;;  %s280_s18 = scalar_lea.vmem [#allocation5], %s1401_s22 }
  0x55   : > { %s287_s10 = sshll.u32 %s280_s18, 4  ;;  %s277_s16 = scalar_lea.sflag [#allocation6], %s276_s13  ;;  %s288_s10 = int_to_ptr.vmem [resolvable:$true] %s287_s10 }
  0x56   : > { %s1112_s23 = scalar_lea.hbm %s1418_s17, 128  ;;  %s1117_s2 = scalar_lea.hbm %s1615_s1, 256 }
  0x57   : > { %p1113_p5 = scmp.ne.s32.totalorder %s1418_s17, %s1112_s23  ;;  %p1118_p6 = scmp.lt.u32.totalorder %s1418_s17, %s1615_s1 }
  0x58   : > { %p1119_p8 = scmp.lt.u32.totalorder %s1117_s2, %s1112_s23  ;;  %p1121_p13 = scmp.lt.u32.totalorder %s1112_s23, %s1418_s17 }
  0x59   : > { %p1115_p1 = pnand %p1113_p5, %p1084_p0 }
  0x5a   : > { %p1120_p10 = por %p1119_p8, %p1118_p6 }
  0x5b   : > { %p1116_p4 = pneg %p1115_p1 }
  0x5c   : > { %p1122_p3 = por %p1121_p13, %p1120_p10 }
  0x5e   : > { %p1123_p7 = pnand %p1122_p3, %p1116_p4 }
  0x60   : > { %1126 = shalt.err (!%p1123_p7)
}
  0x61   : > { %s1127_s22 = scalar_lea.vmem %s288_s10, 128  ;;  %s1254_s11 = smov [#allocation5]  }
  0x62   : > { %p1128_p9 = scmp.ne.s32.totalorder %s288_s10, %s1127_s22  ;;  %s1132_s15 = sshll.u32 %s1254_s11, 4  ;;  %s1133_s15 = int_to_ptr.vmem [resolvable:$false] %s1132_s15 }
  0x63   : > { %s1134_s12 = scalar_lea.vmem %s1133_s15, 256  ;;  %p1135_p1 = scmp.lt.s32.totalorder %s288_s10, %s1133_s15 }
  0x64   : > { %p1130_p2 = pnand %p1128_p9, %p1084_p0  ;;  %p1136_p12 = scmp.lt.s32.totalorder %s1134_s12, %s1127_s22 }
  0x66   : > { %p1131_p5 = pneg %p1130_p2  ;;  %p1137_p6 = por %p1136_p12, %p1135_p1 }
  0x68   : > { %p1138_p8 = pnand %p1137_p6, %p1131_p5 }
  0x6a   : > { %1141 = shalt.err (!%p1138_p8)
}
  0x6b   : > { %986 = dma.hbm_to_vmem [thread:$0]  (!%p1409_p11), %s1418_s17, 128, %s288_s10, %s277_s16  }
  0x6c   : > { %p1641_p4 = scmp.ne.s32.totalorder %s1633_s9, 0 }
  0x6d   : > { %s1469_s13 = sand.u32 (!%p1641_p4), 1, %s1240_s25   ;;  %p1642_p12 = scmp.ne.s32.totalorder (!%p1641_p4), %s1631_s30, 0 }
  0x6e   : > { %296 = sbr.rel (%p1641_p4) target bundleno = 1304 (0x518), region = 44  ;;  %s1472_s18 = sshll.u32 (!%p1641_p4), %s1469_s13, 3 }
  0x6f   : > { %s299_s23 = scalar_lea.sflag (!%p1641_p4), [#allocation3], %s1469_s13  ;;  %s302_s14 = scalar_lea.vmem (!%p1641_p4), [#allocation2], %s1472_s18 }
  0x75   : > { %1215 = dma.done.wait (%p1642_p12), %s299_s23, 128  }
  0x76   : > { %1217 = vsyncadd (%p1642_p12), %s299_s23, 4294967168  ;;  %s307_s9 = sand.u32 1, %s1325_s28   ;;  %s311_s17 = scalar_lea.vmem [#allocation5], %s1472_s18 }
  0x77   : > { %s308_s29 = scalar_lea.sflag [#allocation6], %s307_s9 }
  0x78   : > { %1219 = dma.done.wait (%p1642_p12), %s308_s29, 128  }
  0x79   : > { %1221 = vsyncadd (%p1642_p12), %s308_s29, 4294967168  ;;  %p1643_p11 = scmp.eq.s32.totalorder %s1325_s28, 0 }
  0x7b   : > { %1223 = dma.done.wait (%p1643_p11), [#allocation6], 512   ;;  %p1644_p0 = pmov %p1643_p11 }
  0x7c   : > { %v1255_v0 = vmov 0.0|0.0   ;;  %vm1256_vm0 = vmmov 0   ;;  %v1257_v1 = vmov 0.0   ;;  %v441_v2 = vlaneseq  ;;  %v358_v5 = vld [vmem:[#allocation7] sm:$0xff]  ;;  %v359_v6 = vld [vmem:[#allocation7 + $0x8] sm:$0xff]  ;;  %v360_v7 = vld [vmem:[#allocation7 + $0x10] sm:$0xff] }
  0x7d   : > { %1225 = vsyncadd (%p1644_p0), [#allocation6], 4294966784  ;;  %958 = vmatprep.subr.bf16.mxu0 %v1255_v0  ;;  %945 = vmatprep.mubr.msk.f32.mxu0 %vm1256_vm0, %v1257_v1  ;;  %v959_v8 = vpack.c.bf16 %v359_v6, %v358_v5  ;;  %v361_v9 = vld [vmem:[#allocation7 + $0x18] sm:$0xff]  ;;  %v363_v10 = vld [vmem:[%s1618_s4] sm:$0x3]  ;;  %s1258_s2 = smov 16  }
  0x7e   : > { %948 = vmatprep.subr.mxu1 %v1257_v1  ;;  %950 = vmatprep.mubr.msk.f32.mxu1 %vm1256_vm0, %v1257_v1  ;;  %v442_v3 = vshrl.u32 %v441_v2, 7  ;;  %v362_v12 = vld [vmem:[%s1617_s3] sm:$0x3]  ;;  %v962_v13 = vpack.c.bf16 %v361_v9, %v360_v7  ;;  %vm365_vm1 = vcmask 261120   ;;  %vm446_vm2 = vcmask 130048   ;;  %s1259_s21 = smov 112  }
  0x7f   : > { %960 = vmatpush3.bf16.msra.mxu0 %v959_v8  ;;  %v356_v15 = vld [vmem:[%s302_s14] sm:$0xff]  ;;  %v460_v34 = vand.u32 127, %v441_v2  ;;  %v357_v39 = vld [vmem:[%s311_s17] sm:$0xff]  ;;  %vm483_vm5 = vcmask 64512   ;;  %s912_s26 = sshll.u32 %s1469_s13, 4  ;;  %s927_s12 = sshll.u32 %s1325_s28, 8 }
  0x80   : > { %v582_v4 = vsub.s32 1, %v442_v3  ;;  %961 = vmatprep.subr.bf16.mxu0 %v1255_v0  ;;  %v443_v18 = vsub.s32 0, %v442_v3  ;;  %vm440_vm3 = vcmp.gt.f32.partialorder %v357_v39, 0.0  ;;  %s355_s22 = scalar_lea.vmem [#allocation9], %s912_s26  ;;  %v914_v9 = vld [vmem:[%s1619_s5] ss:$0 sm:$0xff]  ;;  %s1534_s29 = scalar_lea.hbm %s1621_s7, %s927_s12 }
  0x81   : > { %v463_v35 = vsub.s32 %v460_v34, %v442_v3  ;;  %s762_s23 = sshll.u32 %s355_s22, 4  ;;  %s736_s17 = scalar_lea.sflag [#allocation10], %s1469_s13  ;;  %s1536_s23 = int_to_ptr.vmem [resolvable:$true] %s762_s23 }
  0x82   : > { %v599_v11 = vrot.slane %v363_v10, %v582_v4  ;;  %v583_v14 = vrot.slane %v362_v12, %v582_v4  ;;  %v453_v20 = vrot.slane %v363_v10, %v443_v18  ;;  %v444_v27 = vrot.slane %v362_v12, %v443_v18  ;;  %s1142_s30 = scalar_lea.vmem %s1536_s23, 256  ;;  %p1645_p13 = scmp.ne.s32.totalorder %s1639_s19, 0 }
  0x83   : > { %963 = vmatpush3.bf16.msra.mxu0 %v962_v13  ;;  %p1143_p10 = scmp.ne.s32.totalorder %s1536_s23, %s1142_s30  ;;  %s1260_s10 = smov [#allocation9]  }
  0x84   : > { %601 = vrot.lane.b32.xlu0 %v599_v11, %s1258_s2  ;;  %s1146_s16 = sshll.u32 %s1260_s10, 4  ;;  %s1147_s16 = int_to_ptr.vmem [resolvable:$false] %s1146_s16 }
  0x85   : > { %p1144_p3 = pnand %p1143_p10, %p1645_p13  ;;  %s1148_s20 = scalar_lea.vmem %s1147_s16, 512 }
  0x86   : > { %946 = vmatmul.mubr.msk.f32.vlgmr.msra.gmra.mrb[0].mxu0 %vm365_vm1, %v356_v15  ;;  %p1149_p9 = scmp.lt.s32.totalorder %s1536_s23, %s1147_s16  ;;  %p1150_p2 = scmp.lt.s32.totalorder %s1148_s20, %s1142_s30 }
  0x87   : > { %p1145_p7 = pneg %p1144_p3 }
  0x88   : > { %585 = vrot.lane.b32.xlu0 %v583_v14, %s1258_s2  ;;  %p1151_p5 = por %p1150_p2, %p1149_p9 }
  0x8a   : > { %p1152_p1 = pnand %p1151_p5, %p1145_p7 }
  0xf6   : > { %v602_v19 = vpop.permute.xlu0 %601 }
  0xfa   : > { %v586_v24 = vpop.permute.xlu0 %585 }
 0x159   : > { %v435_v16 = vpop.f32.mrb[0].mxu0 }
 0x15a   : > { %1040 = vtanh.f32 %v435_v16  ;;  %v947_v17 = vpop.f32.mrb[1].mxu0  ;;  %949 = vmatpush3.msra.mxu1 %v435_v16 }
 0x15b   : > { %953 = vmatprep.subr.mxu1 %v1257_v1 }
 0x164   : > { %v1041_v21 = vpop.eup %1040 }
 0x165   : > { %v604_v22 = vmul.f32 %v1041_v21, %v602_v19  ;;  %v454_v23 = vmul.f32 %v1041_v21, %v453_v20  ;;  %v588_v26 = vmul.f32 %v1041_v21, %v586_v24  ;;  %v445_v28 = vmul.f32 %v1041_v21, %v444_v27 }
 0x167   : > { %606 = vrot.lane.b32.xlu1 %v604_v22, %s1259_s21  ;;  %v455_v25 = vsel %vm446_vm2, %v454_v23, 0.0  ;;  %v447_v29 = vsel %vm446_vm2, %v445_v28, 0.0 }
 0x168   : > { %456 = vadd.xlane.f32.xlu0 %v455_v25 }
 0x16b   : > { %590 = vrot.lane.b32.xlu1 %v588_v26, %s1259_s21 }
 0x18f   : > { %448 = vadd.xlane.f32.xlu1 %v447_v29 }
 0x1d9   : > { %v607_v30 = vpop.permute.xlu1 %606 }
 0x1da   : > { %v609_v31 = vsel %vm446_vm2, %v607_v30, 0.0 }
 0x1db   : > { %610 = vadd.xlane.f32.xlu0 %v609_v31 }
 0x1dd   : > { %v591_v32 = vpop.permute.xlu1 %590 }
 0x1de   : > { %v593_v33 = vsel %vm446_vm2, %v591_v32, 0.0 }
 0x1df   : > { %594 = vadd.xlane.f32.xlu0 %v593_v33 }
 0x1f5   : > { %v457_v36 = vpop.xlane.xlu0 %456 }
 0x1f6   : > { %v464_v37 = vrot.slane %v457_v36, %v463_v35 }
 0x21c   : > { %v449_v38 = vpop.xlane.xlu1 %448 }
 0x21d   : > { %v478_v40 = vadd.f32 %v464_v37, %v449_v38 }
 0x21f   : > { %v480_v41 = vmul.f32 0.2, %v478_v40  ;;  %vm479_vm4 = vcmp.gt.f32.partialorder %v478_v40, 0.0 }
 0x221   : > { %v481_v42 = vsel %vm479_vm4, %v478_v40, %v480_v41 }
 0x222   : > { %v482_v43 = vsel %vm440_vm3, %v481_v42, -1e+09 }
 0x223   : > { %v484_v44 = vsel %vm483_vm5, %v482_v43, -inf }
 0x224   : > { %485 = vmax.xlane.f32.xlu1 %v484_v44 }
 0x268   : > { %v611_v45 = vpop.xlane.xlu0 %610 }
 0x269   : > { %v616_v46 = vrot.slane %v611_v45, %v463_v35 }
 0x26c   : > { %v595_v47 = vpop.xlane.xlu0 %594 }
 0x26d   : > { %v624_v48 = vadd.f32 %v616_v46, %v595_v47 }
 0x26f   : > { %v626_v49 = vmul.f32 0.2, %v624_v48  ;;  %vm625_vm6 = vcmp.gt.f32.partialorder %v624_v48, 0.0 }
 0x271   : > { %v627_v50 = vsel %vm625_vm6, %v624_v48, %v626_v49 }
 0x272   : > { %v628_v51 = vsel %vm440_vm3, %v627_v50, -1e+09 }
 0x273   : > { %v629_v52 = vsel %vm483_vm5, %v628_v51, -inf }
 0x274   : > { %630 = vmax.xlane.f32.xlu0 %v629_v52 }
 0x2b1   : > { %v486_v53 = vpop.xlane.xlu1 %485 }
 0x2b2   : > { %v487_v54 = vsub.f32 %v482_v43, %v486_v53 }
 0x2b4   : > { %v488_v55 = vmul.f32 1.442695, %v487_v54 }
 0x2b6   : > { %1042 = vpow2.f32 %v488_v55 }
 0x2c0   : > { %v1043_v56 = vpop.eup %1042 }
 0x2c1   : > { %v490_v57 = vsel %vm483_vm5, %v1043_v56, 0.0 }
 0x2c2   : > { %491 = vadd.xlane.f32.xlu1 %v490_v57 }
 0x2d3   : > { %643 = vrot.lane.b32.xlu1 %v435_v16, %s1259_s21 }
 0x301   : > { %v631_v58 = vpop.xlane.xlu0 %630 }
 0x302   : > { %v632_v59 = vsub.f32 %v628_v51, %v631_v58 }
 0x304   : > { %v633_v60 = vmul.f32 1.442695, %v632_v59 }
 0x306   : > { %1044 = vpow2.f32 %v633_v60 }
 0x310   : > { %v1045_v61 = vpop.eup %1044 }
 0x311   : > { %v635_v62 = vsel %vm483_vm5, %v1045_v61, 0.0 }
 0x312   : > { %636 = vadd.xlane.f32.xlu0 %v635_v62 }
 0x34f   : > { %v492_v63 = vpop.xlane.xlu1 %491 }
 0x350   : > { %1046 = vrcp.f32 %v492_v63 }
 0x353   : > { %v644_v3 = vpop.permute.xlu1 %643 }
 0x35a   : > { %v1047_v0 = vpop.eup %1046 }
 0x35b   : > { %v494_v2 = vmul.f32 %v1047_v0, %v1043_v56 }
 0x35d   : > { %951 = vmatmul.mubr.msk.f32.vlgmr.msra.gmra.mrb[0].mxu1 %vm483_vm5, %v494_v2  ;;  %495 = vst.msk [vmem:[%s355_s22] sm:$0xff] %vm483_vm5, %v494_v2 }
 0x35e   : > { %954 = vmatpush3.msra.mxu1 %v644_v3  ;;  %955 = vmatprep.mubr.msk.f32.mxu1 %vm1256_vm0, %v1257_v1 }
 0x39f   : > { %v637_v4 = vpop.xlane.xlu0 %636 }
 0x3a0   : > { %1048 = vrcp.f32 %v637_v4 }
 0x3aa   : > { %v1049_v5 = vpop.eup %1048 }
 0x3ab   : > { %v639_v6 = vmul.f32 %v1049_v5, %v1045_v61 }
 0x3ad   : > { %956 = vmatmul.mubr.msk.f32.vlgmr.msra.gmra.mrb[2].mxu1 %vm483_vm5, %v639_v6  ;;  %917 = vst.msk [vmem:[%s355_s22 + $0x8] sm:$0xff] %vm483_vm5, %v639_v6 }
 0x430   : > { %v571_v7 = vpop.f32.mrb[0].mxu1 }
 0x431   : > { %v952_v8 = vpop.f32.mrb[1].mxu1 }
 0x480   : > { %v715_v10 = vpop.f32.mrb[2].mxu1 }
 0x481   : > { %v716_v11 = vadd.f32 %v914_v9, %v715_v10  ;;  %v957_v12 = vpop.f32.mrb[3].mxu1 }
 0x483   : > { %v720_v1 = vmul.f32 1.442695, %v716_v11 }
 0x485   : > { %1050 = vpow2.f32 %v720_v1 }
 0x486   : > { %1155 = shalt.err (!%p1152_p1)
}
 0x487   : > { %s1156_s21 = scalar_lea.hbm %s1534_s29, 256  ;;  %s1160_s11 = scalar_lea.hbm %s1621_s7, 512 }
 0x488   : > { %p1157_p6 = scmp.ne.s32.totalorder %s1534_s29, %s1156_s21  ;;  %p1161_p12 = scmp.lt.u32.totalorder %s1534_s29, %s1621_s7 }
 0x489   : > { %p1162_p11 = scmp.lt.u32.totalorder %s1160_s11, %s1156_s21  ;;  %p1164_p10 = scmp.lt.u32.totalorder %s1156_s21, %s1534_s29 }
 0x48a   : > { %p1158_p8 = pnand %p1157_p6, %p1645_p13 }
 0x48b   : > { %p1163_p0 = por %p1162_p11, %p1161_p12 }
 0x48c   : > { %p1159_p4 = pneg %p1158_p8 }
 0x48d   : > { %p1165_p3 = por %p1164_p10, %p1163_p0 }
 0x48f   : > { %p1166_p7 = pnand %p1165_p3, %p1159_p4 }
 0x491   : > { %1169 = shalt.err (!%p1166_p7)
}
 0x492   : > { %s1261_s14 = smov 128   ;;  %s1262_s9 = smov 8   ;;  %v1051_v13 = vpop.eup %1050  ;;  %vm719_vm7 = vcmp.gt.f32.partialorder %v716_v11, 0.0  ;;  %v572_v16 = vadd.f32 %v914_v9, %v571_v7 }
 0x493   : > { %973 = dma.vmem_to_hbm [thread:$0]  (%p1645_p13), %s1536_s23, 256, %s1534_s29, %s736_s17, %s1261_s14, %s1261_s14, %s1262_s9   ;;  %v919_v14 = vadd.f32 -1.0, %v1051_v13 }
 0x494   : > { %v576_v17 = vmul.f32 1.442695, %v572_v16  ;;  %s922_s30 = sshll.u32 %s1325_s28, 7  ;;  %s348_s10 = scalar_lea.vmem [#allocation8], %s1472_s18  ;;  %vm575_vm8 = vcmp.gt.f32.partialorder %v572_v16, 0.0 }
 0x495   : > { %v723_v15 = vsel %vm719_vm7, %v716_v11, %v919_v14  ;;  %s749_s16 = sshll.u32 %s348_s10, 4  ;;  %s1568_s17 = scalar_lea.hbm %s1620_s6, %s922_s30  ;;  %s1570_s16 = int_to_ptr.vmem [resolvable:$true] %s749_s16 }
 0x496   : > { %725 = vrot.lane.b32.xlu0 %v723_v15, %s1258_s2  ;;  %1052 = vpow2.f32 %v576_v17  ;;  %s731_s28 = scalar_lea.sflag [#allocation4], %s1469_s13  ;;  %s1170_s18 = scalar_lea.vmem %s1570_s16, 128 }
 0x497   : > { %p1171_p9 = scmp.ne.s32.totalorder %s1570_s16, %s1170_s18  ;;  %s1263_s2 = smov [#allocation8]  }
 0x498   : > { %s1174_s20 = sshll.u32 %s1263_s2, 4  ;;  %s1175_s20 = int_to_ptr.vmem [resolvable:$false] %s1174_s20 }
 0x499   : > { %p1172_p2 = pnand %p1171_p9, %p1645_p13  ;;  %s1176_s21 = scalar_lea.vmem %s1175_s20, 256 }
 0x49a   : > { %p1177_p1 = scmp.lt.s32.totalorder %s1570_s16, %s1175_s20  ;;  %p1178_p6 = scmp.lt.s32.totalorder %s1176_s21, %s1170_s18 }
 0x49b   : > { %p1173_p5 = pneg %p1172_p2 }
 0x49c   : > { %p1179_p8 = por %p1178_p6, %p1177_p1 }
 0x49e   : > { %p1180_p4 = pnand %p1179_p8, %p1173_p5 }
 0x4a0   : > { %v1053_v18 = vpop.eup %1052 }
 0x4a1   : > { %v916_v19 = vadd.f32 -1.0, %v1053_v18 }
 0x4a3   : > { %v579_v20 = vsel %vm575_vm8, %v572_v16, %v916_v19 }
 0x508   : > { %v726_v21 = vpop.permute.xlu0 %725 }
 0x509   : > { %v728_v22 = vsel %vm446_vm2, %v579_v20, %v726_v21 }
 0x50a   : > { %729 = vst.msk [vmem:[%s348_s10] sm:$0xff] %vm365_vm1, %v728_v22 }
 0x50b   : > { %1183 = shalt.err (!%p1180_p4)
}
 0x50c   : > { %s1184_s13 = scalar_lea.hbm %s1568_s17, 128  ;;  %s1188_s11 = scalar_lea.hbm %s1620_s6, 256 }
 0x50d   : > { %p1185_p12 = scmp.ne.s32.totalorder %s1568_s17, %s1184_s13  ;;  %p1189_p10 = scmp.lt.u32.totalorder %s1568_s17, %s1620_s6 }
 0x50e   : > { %p1190_p3 = scmp.lt.u32.totalorder %s1188_s11, %s1184_s13  ;;  %p1192_p9 = scmp.lt.u32.totalorder %s1184_s13, %s1568_s17 }
 0x50f   : > { %p1186_p11 = pnand %p1185_p12, %p1645_p13 }
 0x510   : > { %p1191_p7 = por %p1190_p3, %p1189_p10 }
 0x511   : > { %p1187_p0 = pneg %p1186_p11 }
 0x512   : > { %p1193_p2 = por %p1192_p9, %p1191_p7 }
 0x514   : > { %p1194_p5 = pnand %p1193_p2, %p1187_p0 }
 0x516   : > { %1197 = shalt.err (!%p1194_p5)
}
 0x517   : > { %972 = dma.vmem_to_hbm [thread:$0]  (%p1645_p13), %s1570_s16, 128, %s1568_s17, %s731_s28  }
 0x518 PF: > { %s777_s14 = sand.u32 1, %s1236_s24   ;;  %p1646_p1 = scmp.ne.s32.totalorder %s1632_s8, 0 }
 0x519   : > { %p1647_p6 = scmp.ge.s32.totalorder %s1248_s27, 2  ;;  %s778_s9 = scalar_lea.sflag [#allocation4], %s777_s14 }
 0x51b   : > { %p988_p8 = pnand %p1647_p6, %p1646_p1 }
 0x51d   : > { %1227 = dma.done.wait (!%p988_p8), %s778_s9, 128  }
 0x51e   : > { %1229 = vsyncadd (!%p988_p8), %s778_s9, 4294967168  ;;  %s787_s30 = scalar_lea.sflag [#allocation10], %s777_s14 }
 0x51f   : > { %1231 = dma.done.wait (!%p988_p8), %s787_s30, 256  }
 0x520   : > { %1233 = vsyncadd (!%p988_p8), %s787_s30, 4294967040  ;;  %s1648_s27 = sld [smem:[#allocation17_spill]]  ;;  %s1649_s19 = sld [smem:[#allocation16_spill]] }
 0x521   : > { %s1650_s26 = sld [smem:[#allocation18_spill]]  ;;  %s1651_s24 = smov %s1240_s25 }
 0x526   : > { %p27_p13 = scmp.ge.s32.totalorder %s1648_s27, 4   ;;  %s1652_s25 = smov %s1649_s19 }
 0x528   :  { %29 = sbr.rel (!%p27_p13) target bundleno = 11 (0xb), region = 124 }
 0x52f   :  { %792 = vsyncpa [#allocation3], 1 }
 0x530   :  { %794 = vsyncpa [#allocation3 + $0x1], 1 }
 0x531   :  { %795 = vsyncpa [#allocation6], 1 }
 0x532   :  { %797 = vsyncpa [#allocation6 + $0x1], 1 }
 0x533   :  { %798 = vsyncpa [#allocation4], 1 }
 0x534   :  { %800 = vsyncpa [#allocation4 + $0x1], 1 }
 0x535   :  { %801 = vsyncpa [#allocation10], 1 }
 0x536   :  { %803 = vsyncpa [#allocation10 + $0x1], 1 }

</bundles_post_ra>
